<compile_context>
chip_gen: v7x
topology: tpu7x:2x2x1
jax: 0.10.0
libtpu: 0.0.40
codegen_flags: <defaults>
</compile_context>

<pallas_src>
import functools

import jax
import jax.numpy as jnp
from jax.experimental import pallas as pl
from jax.experimental.pallas import tpu as pltpu

MARGIN = 1.0          # __init__ default for option='dist'
TEMPERATURE = 0.07    # __init__ default for option='infonce'
EPS = 1e-8            # F.cosine_similarity default eps
NEG_BIG = -1e30       # safe "minus infinity" for masked logits


def _round_up(x, m):
    return ((x + m - 1) // m) * m


def _vmem_budget_bytes():
    """Generation-aware VMEM budget (v5e/v6e: 128 MiB physical, v7x: 64 MiB)."""
    try:
        cap = int(pltpu.get_tpu_info().vmem_capacity_bytes)
    except Exception:
        cap = 64 << 20                       # conservative, v7x-sized fallback
    return max(32 << 20, min(cap * 3 // 4, 96 << 20))


# ------------------------------------------------------------------ dist ----
def _dist_kernel(old_ref, new_ref, o_ref):
    x = old_ref[...].astype(jnp.float32)
    y = new_ref[...].astype(jnp.float32)
    dot = jnp.sum(x * y, axis=-1, keepdims=True)      # (TM, 1)
    nx2 = jnp.sum(x * x, axis=-1, keepdims=True)
    ny2 = jnp.sum(y * y, axis=-1, keepdims=True)
    # Fused single rsqrt (EUP slot):
    #   1/(max(||x||,eps)*max(||y||,eps)) == rsqrt(max(nx2,eps^2)*max(ny2,eps^2))
    inv = jax.lax.rsqrt(jnp.maximum(nx2, EPS * EPS) * jnp.maximum(ny2, EPS * EPS))
    # Per-row hinge; out-of-bounds rows of a partial last tile are dropped on
    # writeback, so no explicit row mask is needed.
    o_ref[...] = jnp.maximum(MARGIN - dot * inv, 0.0)


def _dist_row_tile(batch, feat, itemsize, budget):
    # ~2-4 MiB per input block (>= ~85% of measured HBM roofline), dtype-aware,
    # and bounded so 2 inputs x 2 buffers stay well inside the VMEM budget.
    target = min(4 << 20, budget // 8)
    tm = max(8, target // max(1, feat * itemsize))
    tm = min(tm, 8192)
    if tm >= batch:
        return batch                      # full first dim -> always a legal block
    return max(8, (tm // 8) * 8)          # otherwise keep a multiple of 8


def _dist_loss(features_old, features_new):
    B, D = features_old.shape
    itemsize = features_old.dtype.itemsize
    budget = _vmem_budget_bytes()
    tm = _dist_row_tile(B, D, itemsize, budget)
    per_row = pl.pallas_call(
        _dist_kernel,
        out_shape=jax.ShapeDtypeStruct((B, 1), jnp.float32),
        grid_spec=pltpu.PrefetchScalarGridSpec(
            num_scalar_prefetch=0,
            grid=(pl.cdiv(B, tm),),
            in_specs=[pl.BlockSpec((tm, D), lambda i: (i, 0)),
                      pl.BlockSpec((tm, D), lambda i: (i, 0))],
            out_specs=pl.BlockSpec((tm, 1), lambda i: (i, 0))),
        compiler_params=pltpu.CompilerParams(
            dimension_semantics=("parallel",),     # both v7x TCs stream DMAs
            vmem_limit_bytes=budget),
        cost_estimate=pl.CostEstimate(
            flops=8 * B * D,
            transcendentals=B,
            bytes_accessed=2 * B * D * itemsize + B * 4),
    )(features_old, features_new)
    return jnp.mean(per_row)              # tiny O(B) reduction in the wrapper


# --------------------------------------------------------------- infonce ----
def _infonce_kernel(q_ref, k_ref, lse_ref, m_sc, l_sc, *,
                    inv_t, n_total, col_tile, needs_mask):
    c = pl.program_id(1)

    @pl.when(c == 0)
    def _init():
        m_sc[...] = jnp.full_like(m_sc, NEG_BIG)
        l_sc[...] = jnp.zeros_like(l_sc)

    # NT matmul on the MXU: (TR, D) x (TC, D)^T -> (TR, TC), f32 accumulate.
    s = jax.lax.dot_general(q_ref[...], k_ref[...], (((1,), (1,)), ((), ())),
                            preferred_element_type=jnp.float32)
    s = s * inv_t                          # exact f32 temperature scale

    if needs_mask:                         # trace-time: only when N % tc != 0
        col = c * col_tile + jax.lax.broadcasted_iota(jnp.int32, s.shape, 1)
        s = jnp.where(col < n_total, s, NEG_BIG)

    # online softmax (running max / running sum, per row)
    m_prev = m_sc[...]
    m_new = jnp.maximum(m_prev, jnp.max(s, axis=-1, keepdims=True))
    l_sc[...] = (jnp.exp(m_prev - m_new) * l_sc[...]
                 + jnp.sum(jnp.exp(s - m_new), axis=-1, keepdims=True))
    m_sc[...] = m_new

    @pl.when(c == pl.num_programs(1) - 1)
    def _finalize():
        lse_ref[...] = m_sc[...] + jnp.log(l_sc[...])


def _infonce_tiles(n, d, itemsize, budget):
    row_bytes = max(1, d * itemsize)

    # Column (key) tile: keep the whole key matrix resident as one column block
    # when its double-buffered footprint is modest (constant block index ->
    # Pallas fetches it exactly once, zero re-streaming). Otherwise stream
    # 512-row key tiles (power-of-two shrink only if VMEM demands it).
    if 2 * n * row_bytes <= min(8 << 20, budget // 4):
        tc = n
    else:
        tc = 512
        while tc > 128 and 2 * tc * row_bytes > budget // 4:
            tc //= 2
        if tc >= n:
            tc = n

    # Row (query) tile: 512 keeps streamed-key arithmetic intensity above the
    # MXU/HBM crossover on v5e/v6e/v7x; shrink only if VMEM demands it.
    tr = 512
    while tr > 8 and (2 * tr * row_bytes + 4 * tr * tc) > budget // 2:
        tr //= 2
    if n <= tr:
        # split small problems into >=2 row tiles so the "parallel" row axis
        # can land on both TensorCores of a v7x megacore.
        tr = n if n <= 8 else min(n, max(8, _round_up(pl.cdiv(n, 2), 8)))
    return tr, tc


def _info_nce_loss(features_old, features_new):
    B, D = features_old.shape
    N = 2 * B
    dt = features_old.dtype
    itemsize = dt.itemsize
    budget = _vmem_budget_bytes()

    # virtual f = cat([old, new]); kernel computes per-row logsumexp of f.f^T/T.
    f = jnp.concatenate([features_old, features_new], axis=0)
    # TODO(synk): for f32 inputs, casting `f` to bfloat16 here (keeping the f32
    # MXU accumulate) would be 2-4x faster and halve key HBM traffic, but adds
    # ~0.2% relative logit error; left off to stay close to the reference.

    tr, tc = _infonce_tiles(N, D, itemsize, budget)
    n_row_tiles = pl.cdiv(N, tr)
    n_col_tiles = pl.cdiv(N, tc)
    needs_mask = (N % tc) != 0
    k_bytes = N * D * itemsize * (1 if tc == N else n_row_tiles)

    # TODO(synk): if the streamed-key DMA is still exposed at small D, sweep
    # pipeline_mode=pl.Buffered(3) on the k BlockSpec.
    lse = pl.pallas_call(
        functools.partial(_infonce_kernel, inv_t=1.0 / TEMPERATURE, n_total=N,
                          col_tile=tc, needs_mask=needs_mask),
        out_shape=jax.ShapeDtypeStruct((N, 1), jnp.float32),
        grid_spec=pltpu.PrefetchScalarGridSpec(
            num_scalar_prefetch=0,
            grid=(n_row_tiles, n_col_tiles),
            in_specs=[pl.BlockSpec((tr, D), lambda r, c: (r, 0)),   # queries
                      pl.BlockSpec((tc, D), lambda r, c: (c, 0))],  # keys
            out_specs=pl.BlockSpec((tr, 1), lambda r, c: (r, 0)),
            scratch_shapes=[pltpu.VMEM((tr, 1), jnp.float32),   # running max
                            pltpu.VMEM((tr, 1), jnp.float32)]), # running sum
        compiler_params=pltpu.CompilerParams(
            dimension_semantics=("parallel", "arbitrary"),
            vmem_limit_bytes=budget),
        cost_estimate=pl.CostEstimate(
            flops=2 * N * N * D,
            transcendentals=N * N,
            bytes_accessed=N * D * itemsize + k_bytes + N * 4),
    )(f, f)

    # positive ("correct") logit per row = logits[i, labels[i]] :
    #   row i < B  : old_i . old_i / T      row i >= B : new_{i-B} . old_{i-B} / T
    # O(N*D) f32 reduction outside the kernel (frees the 3rd DMA stream + VMEM).
    old32 = features_old.astype(jnp.float32)
    new32 = features_new.astype(jnp.float32)
    correct = jnp.concatenate(
        [jnp.sum(old32 * old32, axis=-1), jnp.sum(new32 * old32, axis=-1)],
        axis=0) / TEMPERATURE

    return jnp.mean(lse[:, 0] - correct)


# ------------------------------------------------------------- dispatcher ---
def contrastive_loss(features_old, features_new, option="dist"):
    """Pallas implementation of ContrastiveLoss.forward (margin/T = defaults)."""
    # TODO(synk): forward-only; jax.grad would need custom_vjp backward kernels.
    if option == "dist":
        return _dist_loss(features_old, features_new)
    if option == "infonce":
        return _info_nce_loss(features_old, features_new)
    return jnp.float32(0.0)   # matches the module's `out = 0` fallthrough


# --------------------------------------------------------------- reference --
def _dist_ref(x, y):
    dot = jnp.sum(x * y, axis=-1)
    nx = jnp.sqrt(jnp.sum(x * x, axis=-1))
    ny = jnp.sqrt(jnp.sum(y * y, axis=-1))
    cos = dot / (jnp.maximum(nx, EPS) * jnp.maximum(ny, EPS))
    return jnp.mean(jax.nn.relu(MARGIN - cos))


def _infonce_ref(x, y):
    f = jnp.concatenate([x, y], axis=0)
    logits = (f @ f.T) / TEMPERATURE
    b = x.shape[0]
    labels = jnp.concatenate([jnp.arange(b), jnp.arange(b)])
    logp = jax.nn.log_softmax(logits, axis=-1)
    return -jnp.mean(logp[jnp.arange(2 * b), labels])


if __name__ == "__main__":
    B, D = 8, 32
    key = jax.random.PRNGKey(0)
    k1, k2 = jax.random.split(key)
    features_old = jax.random.normal(k1, (B, D), dtype=jnp.float32)
    features_new = jax.random.normal(k2, (B, D), dtype=jnp.float32)

    # option='dist' (module default)
    loss_dist = jax.block_until_ready(
        contrastive_loss(features_old, features_new, option="dist"))
    ref_dist = _dist_ref(features_old, features_new)
    assert jnp.allclose(loss_dist, ref_dist, rtol=1e-5, atol=1e-5), (loss_dist, ref_dist)

    # option='infonce'
    loss_nce = jax.block_until_ready(
        contrastive_loss(features_old, features_new, option="infonce"))
    ref_nce = _infonce_ref(features_old, features_new)
    assert jnp.allclose(loss_nce, ref_nce, rtol=1e-4, atol=1e-3), (loss_nce, ref_nce)

    print("KERNEL_OK")
</pallas_src>

<mosaic_0001>
module attributes {stable_mosaic.version = 11 : i64} {
  func.func @_dist_kernel(%arg0: i32, %arg1: memref<8x32xf32, #tpu.memory_space<vmem>>, %arg2: memref<8x32xf32, #tpu.memory_space<vmem>>, %arg3: memref<8x1xf32, #tpu.memory_space<vmem>>) attributes {dimension_semantics = [#tpu.dimension_semantics<parallel>], iteration_bounds = array<i64: 1>, scalar_prefetch = 0 : i64, scratch_operands = 0 : i64, tpu.core_type = #tpu.core_type<tc>, window_params = [{transform_indices = @transform_0, window_bounds = array<i64: 8, 32>}, {transform_indices = @transform_1, window_bounds = array<i64: 8, 32>}, {transform_indices = @transform_2, window_bounds = array<i64: 8, 1>}]} {
    %c0 = arith.constant 0 : index
    %c0_0 = arith.constant 0 : index
    %0 = vector.load %arg1[%c0, %c0_0] : memref<8x32xf32, #tpu.memory_space<vmem>>, vector<8x32xf32>
    %c0_1 = arith.constant 0 : index
    %c0_2 = arith.constant 0 : index
    %1 = vector.load %arg2[%c0_1, %c0_2] : memref<8x32xf32, #tpu.memory_space<vmem>>, vector<8x32xf32>
    %2 = arith.mulf %0, %1 : vector<8x32xf32>
    %cst = arith.constant dense<0.000000e+00> : vector<8xf32>
    %3 = vector.multi_reduction <add>, %2, %cst [1] : vector<8x32xf32> to vector<8xf32>
    %4 = vector.shape_cast %3 : vector<8xf32> to vector<8x1xf32>
    %5 = arith.mulf %0, %0 : vector<8x32xf32>
    %cst_3 = arith.constant dense<0.000000e+00> : vector<8xf32>
    %6 = vector.multi_reduction <add>, %5, %cst_3 [1] : vector<8x32xf32> to vector<8xf32>
    %7 = vector.shape_cast %6 : vector<8xf32> to vector<8x1xf32>
    %8 = arith.mulf %1, %1 : vector<8x32xf32>
    %cst_4 = arith.constant dense<0.000000e+00> : vector<8xf32>
    %9 = vector.multi_reduction <add>, %8, %cst_4 [1] : vector<8x32xf32> to vector<8xf32>
    %10 = vector.shape_cast %9 : vector<8xf32> to vector<8x1xf32>
    %cst_5 = arith.constant 1.000000e-16 : f32
    %11 = vector.broadcast %cst_5 : f32 to vector<8x1xf32>
    %12 = arith.maximumf %7, %11 : vector<8x1xf32>
    %cst_6 = arith.constant 1.000000e-16 : f32
    %13 = vector.broadcast %cst_6 : f32 to vector<8x1xf32>
    %14 = arith.maximumf %10, %13 : vector<8x1xf32>
    %15 = arith.mulf %12, %14 : vector<8x1xf32>
    %16 = math.rsqrt %15 : vector<8x1xf32>
    %17 = arith.mulf %4, %16 : vector<8x1xf32>
    %cst_7 = arith.constant 1.000000e+00 : f32
    %18 = vector.broadcast %cst_7 : f32 to vector<8x1xf32>
    %19 = arith.subf %18, %17 : vector<8x1xf32>
    %cst_8 = arith.constant 0.000000e+00 : f32
    %20 = vector.broadcast %cst_8 : f32 to vector<8x1xf32>
    %21 = arith.maximumf %19, %20 : vector<8x1xf32>
    %c0_9 = arith.constant 0 : index
    %c0_10 = arith.constant 0 : index
    %22 = vector.load %arg3[%c0_9, %c0_10] : memref<8x1xf32, #tpu.memory_space<vmem>>, vector<8x1xf32>
    tpu.vector_store %arg3[%c0_9, %c0_10], %21 {strides = array<i32>} : memref<8x1xf32, #tpu.memory_space<vmem>>, vector<8x1xf32>,
    return
  }
  func.func @transform_0(%arg0: i32) -> (i32, i32) {
    %c0_i32 = arith.constant 0 : i32
    %c0_i32_0 = arith.constant 0 : i32
    return %arg0, %c0_i32 : i32, i32
  }
  func.func @transform_1(%arg0: i32) -> (i32, i32) {
    %c0_i32 = arith.constant 0 : i32
    %c0_i32_0 = arith.constant 0 : i32
    return %arg0, %c0_i32 : i32, i32
  }
  func.func @transform_2(%arg0: i32) -> (i32, i32) {
    %c0_i32 = arith.constant 0 : i32
    %c0_i32_0 = arith.constant 0 : i32
    return %arg0, %c0_i32 : i32, i32
  }
}

</mosaic_0001>

<bundles_post_ra>
// kernel: tpu_custom_call.1
= control target key start
LH: loop header
LB: loop body
LE: loop exit
PB: predicated region body
PF: predicated region fallthrough
CT: control target
= control target key end

     0   :  { %7 = vsyncpa [#allocation3], 0  ;;  %s161_s0 = inlined_call_operand.hbm [shape: f32[8,32], index: 0, kind: input, shape index: {}]   ;;  %s162_s1 = inlined_call_operand.hbm [shape: f32[8,32], index: 1, kind: input, shape index: {}]   ;;  %s163_s2 = inlined_call_operand.vmem [shape: f32[8,1], index: 2, kind: output, shape index: {}]  }
   0x1   :  { %8 = vsyncpa [#allocation5], 0  ;;  %s117_s9 = smov [#allocation2]   ;;  %s118_s11 = smov [#allocation4]  }
   0x2   :  { %s15_s10 = sshll.u32 %s117_s9, 4  ;;  %s25_s12 = sshll.u32 %s118_s11, 4  ;;  %s16_s10 = int_to_ptr.vmem [resolvable:$true] %s15_s10  ;;  %s26_s12 = int_to_ptr.vmem [resolvable:$true] %s25_s12 }
   0x3   :  { %s69_s15 = scalar_lea.hbm %s161_s0, 128 }
   0x4   :  { %p70_p0 = scmp.ne.s32.totalorder %s161_s0, %s69_s15  ;;  %p73_p1 = scmp.lt.u32.totalorder %s69_s15, %s161_s0 }
   0x6   :  { %p75_p2 = pnand %p73_p1, %p70_p0 }
   0x8   :  { %78 = shalt.err (!%p75_p2)
}
   0x9   :  { %s79_s20 = scalar_lea.vmem %s16_s10, 128  ;;  %p84_p4 = scmp.lt.s32.totalorder %s16_s10, %s16_s10 }
   0xa   :  { %p80_p3 = scmp.ne.s32.totalorder %s16_s10, %s79_s20  ;;  %p85_p5 = scmp.lt.s32.totalorder %s79_s20, %s79_s20 }
   0xc   :  { %p86_p6 = por %p85_p5, %p84_p4 }
   0xe   :  { %p87_p7 = pnand %p86_p6, %p80_p3 }
  0x10   :  { %90 = shalt.err (!%p87_p7)
}
  0x11   :  { %18 = dma.hbm_to_vmem [thread:$0]  %s161_s0, 128, %s16_s10, [#allocation3]  }
  0x12   :  { %s91_s25 = scalar_lea.hbm %s162_s1, 128 }
  0x13   :  { %p92_p8 = scmp.ne.s32.totalorder %s162_s1, %s91_s25  ;;  %p95_p9 = scmp.lt.u32.totalorder %s91_s25, %s162_s1 }
  0x15   :  { %p97_p10 = pnand %p95_p9, %p92_p8 }
  0x17   :  { %100 = shalt.err (!%p97_p10)
}
  0x18   :  { %s101_s30 = scalar_lea.vmem %s26_s12, 128  ;;  %p106_p12 = scmp.lt.s32.totalorder %s26_s12, %s26_s12 }
  0x19   :  { %p102_p11 = scmp.ne.s32.totalorder %s26_s12, %s101_s30  ;;  %p107_p13 = scmp.lt.s32.totalorder %s101_s30, %s101_s30 }
  0x1b   :  { %p108_p0 = por %p107_p13, %p106_p12 }
  0x1d   :  { %p109_p1 = pnand %p108_p0, %p102_p11 }
  0x1f   :  { %112 = shalt.err (!%p109_p1)
}
  0x20   :  { %28 = dma.hbm_to_vmem [thread:$0]  %s162_s1, 128, %s26_s12, [#allocation5]  }
  0x21   :  { %113 = dma.done.wait [#allocation3], 128  }
  0x22   :  { %114 = vsyncadd [#allocation3], 4294967168 }
  0x23   :  { %115 = dma.done.wait [#allocation5], 128  }
  0x24   :  { %116 = vsyncadd [#allocation5], 4294967168  ;;  %v35_v0 = vld [vmem:[#allocation2] sm:$0xff]  ;;  %vm38_vm0 = vcmask 261120   ;;  %v36_v1 = vld [vmem:[#allocation4] sm:$0xff]  ;;  %vm57_vm1 = vcmask 7168  }
  0x25   :  { %v42_v2 = vmul.f32 %v35_v0, %v35_v0  ;;  %v46_v3 = vmul.f32 %v36_v1, %v36_v1  ;;  %v37_v4 = vmul.f32 %v36_v1, %v35_v0 }
  0x27   :  { %v43_v5 = vsel %vm38_vm0, %v42_v2, 0.0  ;;  %v39_v6 = vsel %vm38_vm0, %v37_v4, 0.0  ;;  %v47_v7 = vsel %vm38_vm0, %v46_v3, 0.0 }
  0x28   :  { %44 = vadd.xlane.f32.xlu0 %v43_v5  ;;  %40 = vadd.xlane.f32.xlu1 %v39_v6 }
  0x2c   :  { %48 = vadd.xlane.f32.xlu0 %v47_v7 }
  0xb5   :  { %v45_v8 = vpop.xlane.xlu0 %44  ;;  %v41_v13 = vpop.xlane.xlu1 %40 }
  0xb6   :  { %v50_v10 = vmax.f32 %v45_v8, 1e-16 }
  0xb9   :  { %v49_v9 = vpop.xlane.xlu0 %48 }
  0xba   :  { %v51_v11 = vmax.f32 %v49_v9, 1e-16 }
  0xbc   :  { %v52_v12 = vmul.f32 %v51_v11, %v50_v10 }
  0xbe   :  { %67 = vrsqrt.f32 %v52_v12 }
  0xc8   :  { %v68_v14 = vpop.eup %67 }
  0xc9   :  { %v54_v15 = vmul.f32 %v68_v14, %v41_v13 }
  0xcb   :  { %v55_v16 = vsub.f32 1.0, %v54_v15 }
  0xcd   :  { %v56_v17 = vmax.f32 %v55_v16, 0.0 }
  0xcf   :  { %58 = vst.msk [vmem:[%s163_s2] sm:$0xff] %vm57_vm1, %v56_v17 }
  0xd0   :  { %63 = vsyncpa [#allocation3], 1 }
  0xd1   :  { %64 = vsyncpa [#allocation5], 1 }

</bundles_post_ra>
